<compile_context>
chip_gen: v6e
topology: v6e:2x2x1
jax: 0.10.0
libtpu: 0.0.40
codegen_flags: <defaults>
</compile_context>

<pallas_src>
import functools

import jax
import jax.numpy as jnp
from jax.experimental import pallas as pl
from jax.experimental.pallas import tpu as pltpu


def _locked_dropout_kernel(m_ref, x_ref, o_ref):
    """m_ref: (tb, 1, D) scaled mask; x_ref/o_ref: (tb, ts, D)."""
    # Pure streaming multiply in the input dtype; broadcast over the sequence
    # (sublane) axis is stride-0 — no relayout, no temporaries.
    o_ref[...] = x_ref[...] * m_ref[...]


def _make_mask(seed, keep_prob, batch, feat, dtype):
    """Per-(batch, feature) inverted-dropout mask, shape (B, 1, D)."""
    key = jax.random.PRNGKey(seed)
    keep = jax.random.bernoulli(key, p=keep_prob, shape=(batch, 1, feat))
    return (keep.astype(jnp.float32) * (1.0 / keep_prob)).astype(dtype)


def _choose_tiles(batch, seq, feat, itemsize, target_bytes=4 * 1024 * 1024):
    """Pick (tb, ts) so one x block is ~target_bytes (streaming sweet spot)."""
    row_bytes = max(1, feat * itemsize)          # one (1, 1, D) row
    if seq * row_bytes <= target_bytes:
        ts = seq                                 # full seq fits one block
    else:
        ts = (target_bytes // row_bytes) // 8 * 8
        ts = max(8, min(ts, seq))                # multiple of 8 (sublane tile)
    slab_bytes = max(1, ts * row_bytes)
    tb = max(1, min(batch, target_bytes // slab_bytes))
    return tb, ts


def locked_dropout(x, dropout, *, seed=0, training=True,
                   block_b=None, block_s=None):
    """LockedDropout forward. x: (B, S, D); mask shared across the S axis."""
    if not training or dropout == 0.0:
        return x                                 # eval path: identity

    B, S, D = x.shape
    keep_prob = 1.0 - float(dropout)
    tb, ts = _choose_tiles(B, S, D, x.dtype.itemsize)
    if block_b is not None:
        tb = block_b
    if block_s is not None:
        ts = block_s

    mask = _make_mask(seed, keep_prob, B, D, x.dtype)   # (B, 1, D), tiny

    grid = (pl.cdiv(B, tb), pl.cdiv(S, ts))
    return pl.pallas_call(
        _locked_dropout_kernel,
        out_shape=jax.ShapeDtypeStruct((B, S, D), x.dtype),
        grid=grid,
        in_specs=[
            pl.BlockSpec((tb, 1, D), lambda b, s: (b, 0, 0)),   # mask
            pl.BlockSpec((tb, ts, D), lambda b, s: (b, s, 0)),  # x
        ],
        out_specs=pl.BlockSpec((tb, ts, D), lambda b, s: (b, s, 0)),
        compiler_params=pltpu.CompilerParams(
            dimension_semantics=("parallel", "parallel"),
            vmem_limit_bytes=32 * 1024 * 1024,
        ),
    )(mask, x)


if __name__ == "__main__":
    B, S, D = 2, 8, 32
    dropout = 0.25
    keep = 1.0 - dropout
    seed = 0

    x = jax.random.normal(jax.random.PRNGKey(0), (B, S, D), dtype=jnp.float32)

    # Eval mode: identity (PyTorch: `if not self.training: return x`).
    out_eval = locked_dropout(x, dropout, seed=seed, training=False)
    assert bool(jnp.all(out_eval == x)), "eval mode must be identity"

    # Training mode.
    out = jax.block_until_ready(
        locked_dropout(x, dropout, seed=seed, training=True))
    assert out.shape == (B, S, D)

    # Reference: identical mask derivation → must match exactly (no division
    # by near-zero x, so no false failures).
    mask_ref = _make_mask(seed, keep, B, D, x.dtype)                 # (B, 1, D)
    ref = x * mask_ref
    assert bool(jnp.allclose(out, ref, rtol=1e-6, atol=1e-6)), (
        "kernel output must equal x * (bernoulli(keep)/keep) with the mask "
        "shared across the sequence axis")

    # Mask values are in {0, 1/keep}; expect a non-degenerate draw at B*D=64.
    mvals = mask_ref[:, 0, :]
    is_zero = mvals == 0.0
    is_keep = jnp.abs(mvals - 1.0 / keep) < 1e-6
    assert bool(jnp.all(is_zero | is_keep)), "mask values must be in {0, 1/keep}"
    n_drop = int(jnp.sum(is_zero))
    assert 0 < n_drop < B * D, "degenerate dropout mask (all kept or all dropped)"

    # Determinism: same seed -> same mask -> same output.
    out2 = jax.block_until_ready(
        locked_dropout(x, dropout, seed=seed, training=True))
    assert bool(jnp.all(out == out2)), "same seed must give the same output"

    print("KERNEL_OK")
</pallas_src>

<mosaic_0001>
module attributes {stable_mosaic.version = 11 : i64} {
  func.func @_locked_dropout_kernel(%arg0: i32, %arg1: i32, %arg2: memref<2x1x32xf32, #tpu.memory_space<vmem>>, %arg3: memref<2x8x32xf32, #tpu.memory_space<vmem>>, %arg4: memref<2x8x32xf32, #tpu.memory_space<vmem>>) attributes {dimension_semantics = [#tpu.dimension_semantics<parallel>, #tpu.dimension_semantics<parallel>], iteration_bounds = array<i64: 1, 1>, scalar_prefetch = 0 : i64, scratch_operands = 0 : i64, tpu.core_type = #tpu.core_type<tc>, window_params = [{transform_indices = @transform_0, window_bounds = array<i64: 2, 1, 32>}, {transform_indices = @transform_1, window_bounds = array<i64: 2, 8, 32>}, {transform_indices = @transform_2, window_bounds = array<i64: 2, 8, 32>}]} {
    %c0 = arith.constant 0 : index
    %c0_0 = arith.constant 0 : index
    %c0_1 = arith.constant 0 : index
    %0 = vector.load %arg3[%c0, %c0_0, %c0_1] : memref<2x8x32xf32, #tpu.memory_space<vmem>>, vector<2x8x32xf32>
    %c0_2 = arith.constant 0 : index
    %c0_3 = arith.constant 0 : index
    %c0_4 = arith.constant 0 : index
    %1 = vector.load %arg2[%c0_2, %c0_3, %c0_4] : memref<2x1x32xf32, #tpu.memory_space<vmem>>, vector<2x1x32xf32>
    %2 = vector.broadcast %1 : vector<2x1x32xf32> to vector<2x8x32xf32>
    %3 = arith.mulf %0, %2 : vector<2x8x32xf32>
    %c0_5 = arith.constant 0 : index
    %c0_6 = arith.constant 0 : index
    %c0_7 = arith.constant 0 : index
    %4 = vector.load %arg4[%c0_5, %c0_6, %c0_7] : memref<2x8x32xf32, #tpu.memory_space<vmem>>, vector<2x8x32xf32>
    tpu.vector_store %arg4[%c0_5, %c0_6, %c0_7], %3 {strides = array<i32>} : memref<2x8x32xf32, #tpu.memory_space<vmem>>, vector<2x8x32xf32>,
    return
  }
  func.func @transform_0(%arg0: i32, %arg1: i32) -> (i32, i32, i32) {
    %c0_i32 = arith.constant 0 : i32
    %c0_i32_0 = arith.constant 0 : i32
    %c0_i32_1 = arith.constant 0 : i32
    return %arg0, %c0_i32, %c0_i32_0 : i32, i32, i32
  }
  func.func @transform_1(%arg0: i32, %arg1: i32) -> (i32, i32, i32) {
    %c0_i32 = arith.constant 0 : i32
    %c0_i32_0 = arith.constant 0 : i32
    return %arg0, %arg1, %c0_i32 : i32, i32, i32
  }
  func.func @transform_2(%arg0: i32, %arg1: i32) -> (i32, i32, i32) {
    %c0_i32 = arith.constant 0 : i32
    %c0_i32_0 = arith.constant 0 : i32
    return %arg0, %arg1, %c0_i32 : i32, i32, i32
  }
}

</mosaic_0001>

<bundles_post_ra>
// kernel: tpu_custom_call.1
= control target key start
LH: loop header
LB: loop body
LE: loop exit
PB: predicated region body
PF: predicated region fallthrough
CT: control target
= control target key end

     0   :  { %7 = vsyncpa [#allocation3], 0  ;;  %s185_s0 = inlined_call_operand.hbm [shape: f32[2,1,32], index: 0, kind: input, shape index: {}]   ;;  %s186_s1 = inlined_call_operand.hbm [shape: f32[2,8,32], index: 1, kind: input, shape index: {}]   ;;  %s187_s2 = inlined_call_operand.hbm [shape: f32[2,8,32], index: 2, kind: output, shape index: {}]  }
   0x1   :  { %8 = vsyncpa [#allocation6], 0 }
   0x2   :  { %9 = vsyncpa [#allocation4], 0  ;;  %s154_s9 = smov [#allocation2]  }
   0x3   :  { %s15_s10 = sshll.u32 %s154_s9, 4  ;;  %s16_s10 = int_to_ptr.vmem [resolvable:$true] %s15_s10 }
   0x4   :  { %s96_s11 = scalar_lea.vmem %s16_s10, 32  ;;  %p101_p1 = scmp.lt.s32.totalorder %s16_s10, %s16_s10 }
   0x5   :  { %p97_p0 = scmp.ne.s32.totalorder %s16_s10, %s96_s11  ;;  %p102_p2 = scmp.lt.s32.totalorder %s96_s11, %s96_s11 }
   0x7   :  { %p103_p3 = por %p102_p2, %p101_p1 }
   0x9   :  { %p104_p4 = pnand %p103_p3, %p97_p0 }
   0xb   :  { %107 = shalt.err (!%p104_p4)
}
   0xc   :  { %s155_s12 = smov 16   ;;  %s156_s13 = smov 1  }
   0xd   :  { %21 = dma.hbm_to_vmem [thread:$0]  %s185_s0, 32, %s16_s10, [#allocation3], %s155_s12, %s155_s12, %s156_s13  }
   0xe   :  { %s157_s16 = smov [#allocation5]  }
   0xf   :  { %s27_s17 = sshll.u32 %s157_s16, 4  ;;  %s28_s17 = int_to_ptr.vmem [resolvable:$true] %s27_s17 }
  0x10   :  { %s116_s18 = scalar_lea.vmem %s28_s17, 256  ;;  %p121_p6 = scmp.lt.s32.totalorder %s28_s17, %s28_s17 }
  0x11   :  { %p117_p5 = scmp.ne.s32.totalorder %s28_s17, %s116_s18  ;;  %p122_p7 = scmp.lt.s32.totalorder %s116_s18, %s116_s18 }
  0x13   :  { %p123_p8 = por %p122_p7, %p121_p6 }
  0x15   :  { %p124_p9 = pnand %p123_p8, %p117_p5 }
  0x17   :  { %127 = shalt.err (!%p124_p9)
}
  0x18   :  { %s158_s19 = smov 128   ;;  %s159_s20 = smov 8  }
  0x19   :  { %33 = dma.hbm_to_vmem [thread:$0]  %s186_s1, 256, %s28_s17, [#allocation6], %s158_s19, %s158_s19, %s159_s20  }
  0x1a   :  { %148 = dma.done.wait [#allocation3], 32  }
  0x1b   :  { %149 = vsyncadd [#allocation3], 4294967264 }
  0x1c   :  { %150 = dma.done.wait [#allocation6], 256  }
  0x1d   :  { %151 = vsyncadd [#allocation6], 4294967040  ;;  %s160_s0 = smov [#allocation7]   ;;  %v40_v0 = vld [vmem:[#allocation5] sm:$0xff]  ;;  %v79_v1 = vld [vmem:[#allocation2] ss:$0 sm:$0xff] }
  0x1e   :  { %s66_s23 = sshll.u32 %s160_s0, 4  ;;  %vm58_vm0 = vcmask 261120   ;;  %v41_v2 = vld [vmem:[#allocation5 + $0x8] sm:$0xff]  ;;  %v56_v3 = vmul.f32 %v79_v1, %v40_v0  ;;  %v80_v4 = vld [vmem:[#allocation2 + $0x1] ss:$0 sm:$0xff]  ;;  %s67_s23 = int_to_ptr.vmem [resolvable:$true] %s66_s23 }
  0x1f   :  { %v57_v5 = vmul.f32 %v80_v4, %v41_v2  ;;  %s128_s24 = scalar_lea.vmem %s67_s23, 256  ;;  %p133_p11 = scmp.lt.s32.totalorder %s67_s23, %s67_s23 }
  0x20   :  { %59 = vst.msk [vmem:[#allocation7] sm:$0xff] %vm58_vm0, %v56_v3  ;;  %p129_p10 = scmp.ne.s32.totalorder %s67_s23, %s128_s24  ;;  %p134_p12 = scmp.lt.s32.totalorder %s128_s24, %s128_s24 }
  0x21   :  { %60 = vst.msk [vmem:[#allocation7 + $0x8] sm:$0xff] %vm58_vm0, %v57_v5 }
  0x22   :  { %p135_p13 = por %p134_p12, %p133_p11 }
  0x24   :  { %p136_p0 = pnand %p135_p13, %p129_p10 }
  0x26   :  { %139 = shalt.err (!%p136_p0)
}
  0x27   :  { %72 = dma.vmem_to_hbm [thread:$0]  %s67_s23, 256, %s187_s2, [#allocation4], %s158_s19, %s158_s19, %s159_s20  }
  0x28   :  { %152 = dma.done.wait [#allocation4], 256  }
  0x29   :  { %153 = vsyncadd [#allocation4], 4294967040 }
  0x2a   :  { %76 = vsyncpa [#allocation3], 1 }
  0x2b   :  { %77 = vsyncpa [#allocation6], 1 }
  0x2c   :  { %78 = vsyncpa [#allocation4], 1 }

</bundles_post_ra>
